<compile_context>
chip_gen: v7x
topology: tpu7x:2x2x1
jax: 0.10.0
libtpu: 0.0.40
codegen_flags: <defaults>
</compile_context>

<pallas_src>
import jax
import jax.numpy as jnp
from jax.experimental import pallas as pl
from jax.experimental.pallas import tpu as pltpu


# ---------------------------------------------------------------------------
# tiling helpers
# ---------------------------------------------------------------------------
def _round_up(x, m):
    return ((x + m - 1) // m) * m


def _choose_tiles(n, tm, tk):
    """Clamp (tm, tk) to the graph size while keeping tm | tk | n_pad."""
    assert tm % 128 == 0 and tk % 128 == 0 and tk % tm == 0, (
        "pick tm, tk as multiples of 128 with tm dividing tk (e.g. 512 / 1024)")
    tm_eff = min(tm, _round_up(n, 128))
    tk_eff = min(tk, _round_up(n, tm_eff))
    n_pad = _round_up(n, tk_eff)
    assert tk_eff % tm_eff == 0 and n_pad % tk_eff == 0 and n_pad % tm_eff == 0
    return tm_eff, tk_eff, n_pad


# ---------------------------------------------------------------------------
# Stage 1: P1 = X @ W1        (reassociation: fc1(A@X) == A@(X@W1) + b1)
# ---------------------------------------------------------------------------
def _xw_kernel(x_ref, w_ref, o_ref):
    o_ref[...] = jnp.dot(
        x_ref[...], w_ref[...], preferred_element_type=jnp.float32
    ).astype(o_ref.dtype)


# ---------------------------------------------------------------------------
# Stage 2: Y1 = relu(A @ P1 + b1) @ W2   (Z1 row-tile fused into its W2 projection)
# ---------------------------------------------------------------------------
def _prop1_kernel(a_ref, p1_ref, b1_ref, w2_ref, y1_ref, acc_ref):
    k = pl.program_id(1)

    @pl.when(k == 0)
    def _():
        acc_ref[...] = jnp.zeros_like(acc_ref)

    acc_ref[...] += jnp.dot(a_ref[...], p1_ref[...], preferred_element_type=jnp.float32)

    @pl.when(k == pl.num_programs(1) - 1)
    def _():
        # dropout == identity in eval mode
        z1 = jnp.maximum(acc_ref[...] + b1_ref[...], 0.0)
        y1_ref[...] = jnp.dot(
            z1.astype(w2_ref.dtype), w2_ref[...], preferred_element_type=jnp.float32
        ).astype(y1_ref.dtype)


# ---------------------------------------------------------------------------
# Stage 3: out = log_softmax(relu(A @ Y1 + b2) @ W3 + b3)
# ---------------------------------------------------------------------------
def _prop2_kernel(a_ref, y1_ref, b2_ref, w3_ref, b3_ref, o_ref, acc_ref):
    k = pl.program_id(1)

    @pl.when(k == 0)
    def _():
        acc_ref[...] = jnp.zeros_like(acc_ref)

    acc_ref[...] += jnp.dot(a_ref[...], y1_ref[...], preferred_element_type=jnp.float32)

    @pl.when(k == pl.num_programs(1) - 1)
    def _():
        z2 = jnp.maximum(acc_ref[...] + b2_ref[...], 0.0)
        z3 = jnp.dot(
            z2.astype(w3_ref.dtype), w3_ref[...], preferred_element_type=jnp.float32
        ) + b3_ref[...]
        # numerically stable log_softmax on the narrow (TM, C) view
        m = jnp.max(z3, axis=-1, keepdims=True)
        s = z3 - m
        lse = jnp.log(jnp.sum(jnp.exp(s), axis=-1, keepdims=True))
        o_ref[...] = (s - lse).astype(o_ref.dtype)


# ---------------------------------------------------------------------------
# One-time input preparation (hoisted out of the per-call forward)
# ---------------------------------------------------------------------------
def prepare_inputs(X, A, *, tm=512, tk=1024, compute_dtype=jnp.bfloat16):
    """Cast + zero-pad X and A to tile-divisible shapes.

    Call ONCE per graph and reuse (Xp, Ap, meta) across forward passes:
    padding/casting A is itself a full pass over an N^2 array and must not be
    paid every call.  Padded rows/cols of A must remain EXACTLY zero (stage 3
    correctness relies on the zero columns masking the relu(b1)@W2 garbage in
    padded rows of Y1).
    """
    N, F = X.shape
    assert A.shape == (N, N)
    tm_eff, tk_eff, n_pad = _choose_tiles(N, tm, tk)
    Xp = jnp.zeros((n_pad, F), compute_dtype).at[:N].set(X.astype(compute_dtype))
    Ap = jnp.zeros((n_pad, n_pad), compute_dtype).at[:N, :N].set(A.astype(compute_dtype))
    return Xp, Ap, dict(n_valid=N, tm=tm_eff, tk=tk_eff)


# ---------------------------------------------------------------------------
# Forward over prepared (padded / cast) inputs
# ---------------------------------------------------------------------------
def gnn_forward_padded(Xp, Ap, params, *, n_valid, tm, tk):
    compute_dtype = Ap.dtype
    n_pad, F = Xp.shape
    H1 = params["w1"].shape[1]
    H2 = params["w2"].shape[1]
    C = params["w3"].shape[1]
    assert Ap.shape == (n_pad, n_pad)
    assert n_pad % tm == 0 and n_pad % tk == 0

    w1 = params["w1"].astype(compute_dtype)
    w2 = params["w2"].astype(compute_dtype)
    w3 = params["w3"].astype(compute_dtype)
    # biases stay f32: they are added onto the f32 accumulator
    b1 = params["b1"].astype(jnp.float32)
    b2 = params["b2"].astype(jnp.float32)
    b3 = params["b3"].astype(jnp.float32)

    mt = n_pad // tm
    kt = n_pad // tk

    # --- stage 1: P1 = X @ W1 ------------------------------------------------
    p1 = pl.pallas_call(
        _xw_kernel,
        out_shape=jax.ShapeDtypeStruct((n_pad, H1), compute_dtype),
        grid_spec=pltpu.PrefetchScalarGridSpec(
            num_scalar_prefetch=0,
            grid=(mt,),
            in_specs=[
                pl.BlockSpec((tm, F), lambda i: (i, 0)),   # X row tile
                pl.BlockSpec((F, H1), lambda i: (0, 0)),   # W1 resident
            ],
            out_specs=pl.BlockSpec((tm, H1), lambda i: (i, 0)),
        ),
        compiler_params=pltpu.CompilerParams(dimension_semantics=("parallel",)),
    )(Xp, w1)

    # --- stage 2: Y1 = relu(A @ P1 + b1) @ W2 ---------------------------------
    y1 = pl.pallas_call(
        _prop1_kernel,
        out_shape=jax.ShapeDtypeStruct((n_pad, H2), compute_dtype),
        grid_spec=pltpu.PrefetchScalarGridSpec(
            num_scalar_prefetch=0,
            grid=(mt, kt),
            in_specs=[
                pl.BlockSpec((tm, tk), lambda i, k: (i, k)),   # A row tile, streamed
                pl.BlockSpec((tk, H1), lambda i, k: (k, 0)),   # matching P1 rows
                pl.BlockSpec((1, H1), lambda i, k: (0, 0)),    # b1 resident
                pl.BlockSpec((H1, H2), lambda i, k: (0, 0)),   # W2 resident
            ],
            out_specs=pl.BlockSpec((tm, H2), lambda i, k: (i, 0)),
            scratch_shapes=[pltpu.VMEM((tm, H1), jnp.float32)],
        ),
        compiler_params=pltpu.CompilerParams(
            dimension_semantics=("parallel", "arbitrary")
        ),
    )(Ap, p1, b1, w2)

    # --- stage 3: out = log_softmax(relu(A @ Y1 + b2) @ W3 + b3) --------------
    out = pl.pallas_call(
        _prop2_kernel,
        out_shape=jax.ShapeDtypeStruct((n_pad, C), jnp.float32),
        grid_spec=pltpu.PrefetchScalarGridSpec(
            num_scalar_prefetch=0,
            grid=(mt, kt),
            in_specs=[
                pl.BlockSpec((tm, tk), lambda i, k: (i, k)),   # A row tile (2nd pass)
                pl.BlockSpec((tk, H2), lambda i, k: (k, 0)),   # matching Y1 rows
                pl.BlockSpec((1, H2), lambda i, k: (0, 0)),    # b2 resident
                pl.BlockSpec((H2, C), lambda i, k: (0, 0)),    # W3 resident
                pl.BlockSpec((1, C), lambda i, k: (0, 0)),     # b3 resident
            ],
            out_specs=pl.BlockSpec((tm, C), lambda i, k: (i, 0)),
            scratch_shapes=[pltpu.VMEM((tm, H2), jnp.float32)],
        ),
        compiler_params=pltpu.CompilerParams(
            dimension_semantics=("parallel", "arbitrary")
        ),
    )(Ap, y1, b2, w3, b3)

    return out[:n_valid]


def gnn_forward(X, A, params, *, tm=512, tk=1024, compute_dtype=jnp.bfloat16):
    """Convenience wrapper (prepares inputs per call).

    For repeated calls on the same graph, call prepare_inputs() once and reuse
    gnn_forward_padded() — that avoids an extra full HBM pass over A per forward.
    """
    Xp, Ap, meta = prepare_inputs(X, A, tm=tm, tk=tk, compute_dtype=compute_dtype)
    return gnn_forward_padded(Xp, Ap, params, **meta)


# ---------------------------------------------------------------------------
# Reference + init
# ---------------------------------------------------------------------------
def init_params(key, n_feat, n_hidden_1, n_hidden_2, n_class):
    """Deterministic init mimicking nn.Linear's uniform(-1/sqrt(in), 1/sqrt(in))."""
    ks = jax.random.split(key, 6)

    def lin(kw, kb, fan_in, fan_out):
        bound = 1.0 / jnp.sqrt(fan_in)
        w = jax.random.uniform(kw, (fan_in, fan_out), jnp.float32, -bound, bound)
        b = jax.random.uniform(kb, (1, fan_out), jnp.float32, -bound, bound)
        return w, b

    w1, b1 = lin(ks[0], ks[1], n_feat, n_hidden_1)
    w2, b2 = lin(ks[2], ks[3], n_hidden_1, n_hidden_2)
    w3, b3 = lin(ks[4], ks[5], n_hidden_2, n_class)
    return dict(w1=w1, b1=b1, w2=w2, b2=b2, w3=w3, b3=b3)


def gnn_reference(X, A, params):
    """Plain-JAX reference for sanity checking (dropout = eval-mode identity)."""
    Z = jnp.maximum(A @ X @ params["w1"] + params["b1"], 0.0)
    Z = jnp.maximum(A @ Z @ params["w2"] + params["b2"], 0.0)
    Z = Z @ params["w3"] + params["b3"]
    return jax.nn.log_softmax(Z, axis=-1)


def _make_graph(kx, ka, n, n_feat):
    X = jax.random.normal(kx, (n, n_feat), dtype=jnp.float32)
    raw = (jax.random.uniform(ka, (n, n)) > 0.9).astype(jnp.float32)
    adj = jnp.maximum(raw, raw.T) + jnp.eye(n, dtype=jnp.float32)
    A = adj / jnp.sum(adj, axis=1, keepdims=True)   # row-normalized + self loops
    return X, A


if __name__ == "__main__":
    key = jax.random.PRNGKey(0)
    k_x, k_a, k_p, k_x2, k_a2 = jax.random.split(key, 5)

    # Small but tileable graph: 256 nodes, 64 features, hidden 32/32, 8 classes.
    N, n_feat, n_hidden_1, n_hidden_2, n_class = 256, 64, 32, 32, 8
    X, A = _make_graph(k_x, k_a, N, n_feat)
    params = init_params(k_p, n_feat, n_hidden_1, n_hidden_2, n_class)
    ref = gnn_reference(X, A, params)

    # (1) f32 path with small tiles -> exercises the multi-step (mt=2, kt=2) grid.
    out_f32 = jax.block_until_ready(
        gnn_forward(X, A, params, tm=128, tk=128, compute_dtype=jnp.float32))
    assert out_f32.shape == (N, n_class)
    assert jnp.allclose(out_f32, ref, atol=2e-3, rtol=2e-3), float(
        jnp.max(jnp.abs(out_f32 - ref)))

    # (2) default path: bf16 A/P1/Y1, roofline-sized (clamped) tiles, f32 accumulation.
    #     Demonstrates the prepare-once / forward-many pattern.
    Xp, Ap, meta = prepare_inputs(X, A)                       # once per graph
    out_bf16 = jax.block_until_ready(gnn_forward_padded(Xp, Ap, params, **meta))
    _ = jax.block_until_ready(gnn_forward_padded(Xp, Ap, params, **meta))  # reuse, no re-pad
    assert out_bf16.shape == (N, n_class)
    assert jnp.allclose(out_bf16, ref, atol=0.25), float(
        jnp.max(jnp.abs(out_bf16 - ref)))
    agree = jnp.mean(
        (jnp.argmax(out_bf16, -1) == jnp.argmax(ref, -1)).astype(jnp.float32))
    assert float(agree) >= 0.9, float(agree)   # bf16 A must not perturb predictions

    # (3) non-tile-divisible N with tm != tk -> exercises padding + zero-column invariant.
    Ns = 300
    Xs, As = _make_graph(k_x2, k_a2, Ns, n_feat)
    out_s = jax.block_until_ready(
        gnn_forward(Xs, As, params, tm=128, tk=256, compute_dtype=jnp.float32))
    ref_s = gnn_reference(Xs, As, params)
    assert out_s.shape == (Ns, n_class)
    assert jnp.allclose(out_s, ref_s, atol=2e-3, rtol=2e-3), float(
        jnp.max(jnp.abs(out_s - ref_s)))

    print("KERNEL_OK")
</pallas_src>

<mosaic_0001>
module attributes {stable_mosaic.version = 11 : i64} {
  func.func @_xw_kernel(%arg0: i32, %arg1: memref<128x64xf32, #tpu.memory_space<vmem>>, %arg2: memref<64x32xf32, #tpu.memory_space<vmem>>, %arg3: memref<128x32xf32, #tpu.memory_space<vmem>>) attributes {dimension_semantics = [#tpu.dimension_semantics<parallel>], iteration_bounds = array<i64: 2>, scalar_prefetch = 0 : i64, scratch_operands = 0 : i64, tpu.core_type = #tpu.core_type<tc>, window_params = [{transform_indices = @transform_0, window_bounds = array<i64: 128, 64>}, {pipeline_mode = #tpu.pipeline_mode<synchronous>, transform_indices = @transform_1, window_bounds = array<i64: 64, 32>}, {transform_indices = @transform_2, window_bounds = array<i64: 128, 32>}]} {
    %c0 = arith.constant 0 : index
    %c0_0 = arith.constant 0 : index
    %0 = vector.load %arg1[%c0, %c0_0] : memref<128x64xf32, #tpu.memory_space<vmem>>, vector<128x64xf32>
    %c0_1 = arith.constant 0 : index
    %c0_2 = arith.constant 0 : index
    %1 = vector.load %arg2[%c0_1, %c0_2] : memref<64x32xf32, #tpu.memory_space<vmem>>, vector<64x32xf32>
    %cst = arith.constant dense<0.000000e+00> : vector<128x32xf32>
    %2 = tpu.matmul %0, %1, %cst {dimension_numbers = #tpu.dot_dimension_numbers<[1], [0], [0], [1], [0, 0, 1, 1], [], []>} : vector<128x64xf32>, vector<64x32xf32>, vector<128x32xf32> -> vector<128x32xf32>
    %c0_3 = arith.constant 0 : index
    %c0_4 = arith.constant 0 : index
    %3 = vector.load %arg3[%c0_3, %c0_4] : memref<128x32xf32, #tpu.memory_space<vmem>>, vector<128x32xf32>
    tpu.vector_store %arg3[%c0_3, %c0_4], %2 {strides = array<i32>} : memref<128x32xf32, #tpu.memory_space<vmem>>, vector<128x32xf32>,
    return
  }
  func.func @transform_0(%arg0: i32) -> (i32, i32) {
    %c0_i32 = arith.constant 0 : i32
    %c0_i32_0 = arith.constant 0 : i32
    return %arg0, %c0_i32 : i32, i32
  }
  func.func @transform_1(%arg0: i32) -> (i32, i32) {
    %c0_i32 = arith.constant 0 : i32
    %c0_i32_0 = arith.constant 0 : i32
    %c0_i32_1 = arith.constant 0 : i32
    return %c0_i32, %c0_i32_0 : i32, i32
  }
  func.func @transform_2(%arg0: i32) -> (i32, i32) {
    %c0_i32 = arith.constant 0 : i32
    %c0_i32_0 = arith.constant 0 : i32
    return %arg0, %c0_i32 : i32, i32
  }
}

</mosaic_0001>

<bundles_post_ra>
// kernel: tpu_custom_call.1
= control target key start
LH: loop header
LB: loop body
LE: loop exit
PB: predicated region body
PF: predicated region fallthrough
CT: control target
= control target key end

     0   :  { %s584_s9 = smov 0   ;;  %s700_s0 = inlined_call_operand.vmem [shape: f32[256,64], index: 0, kind: input, shape index: {}]   ;;  %s701_s1 = inlined_call_operand.vmem [shape: f32[64,32], index: 1, kind: input, shape index: {}]   ;;  %s702_s2 = inlined_call_operand.vmem [shape: f32[256,32], index: 2, kind: output, shape index: {}]  }
   0x1 LB: > { %s438_s10 = sadd.s32 4294967295, %s567_s9   ;;  %p442_p0 = scmp.ge.s32.totalorder %s567_s9, 1  ;;  %s567_s9 = sphi %s584_s9, %s12_s9  }
   0x2   : > { %p113_p1 = scmp.lt.s32.totalorder %s567_s9, 3 }
   0x4   : > { %p114_p2 = pnand %p442_p0, %p113_p1 }
   0x5   : > { %v163_v0 = vld [vmem:[%s701_s1] sm:$0xff] (!%p114_p2)  ;;  %v164_v1 = vld [vmem:[%s701_s1 + $0x8] sm:$0xff] (!%p114_p2)  ;;  %v165_v2 = vld [vmem:[%s701_s1 + $0x10] sm:$0xff] (!%p114_p2)  ;;  %s443_s17 = sshll.u32 (!%p114_p2), %s438_s10, 4  ;;  %vm171_vm0 = vcmask (!%p114_p2), 523264   ;;  %vm365_vm1 = vcmask (!%p114_p2), 261120  }
   0x6   : > { %117 = sbr.rel (%p114_p2) target bundleno = 251 (0xfb), region = 28  ;;  %v529_v3 = vpack.c.bf16 (!%p114_p2), %v164_v1, %v163_v0  ;;  %v166_v4 = vld [vmem:[%s701_s1 + $0x18] sm:$0xff] (!%p114_p2)  ;;  %p136_p3 = scmp.lt.s32.totalorder (!%p114_p2), %s443_s17, 31  ;;  %v167_v6 = vld [vmem:[%s701_s1 + $0x20] sm:$0xff] (!%p114_p2)  ;;  %v168_v7 = vld [vmem:[%s701_s1 + $0x28] sm:$0xff] (!%p114_p2) }
   0x7   : > { %v533_v5 = vpack.c.bf16 (!%p114_p2), %v166_v4, %v165_v2  ;;  %v537_v8 = vpack.c.bf16 (!%p114_p2), %v168_v7, %v167_v6  ;;  %v169_v9 = vld [vmem:[%s701_s1 + $0x30] sm:$0xff] (!%p114_p2)  ;;  %v170_v10 = vld [vmem:[%s701_s1 + $0x38] sm:$0xff] (!%p114_p2) }
   0x8   : > { %530 = vmatprep.subr.bf16.mxu0 (!%p114_p2), %v529_v3  ;;  %545 = vmatprep.subr.bf16.mxu1 (!%p114_p2), %v529_v3  ;;  %v541_v13 = vpack.c.bf16 (!%p114_p2), %v170_v10, %v169_v9 }
   0x9   : > { %532 = vmatpush3.bf16.msra.mxu0 (!%p114_p2), %v529_v3  ;;  %549 = vmatpush3.bf16.msra.mxu1 (!%p114_p2), %v529_v3 }
   0xa   : > { %534 = vmatprep.subr.bf16.mxu0 (!%p114_p2), %v533_v5  ;;  %546 = vmatprep.subr.bf16.mxu1 (!%p114_p2), %v533_v5 }
   0xd   : > { %s704_s17 = smov (!%p136_p3, %s443_s17), 31  ;;  %536 = vmatpush3.bf16.msra.mxu0 %v533_v5  ;;  %550 = vmatpush3.bf16.msra.mxu1 %v533_v5 }
   0xe   : > { %s444_s24 = sshll.u32 %s704_s17, 3  ;;  %538 = vmatprep.subr.bf16.mxu0 %v537_v8  ;;  %547 = vmatprep.subr.bf16.mxu1 %v537_v8 }
   0xf   : > { %s624_s3 = scalar_lea.vmem %s700_s0, %s444_s24  ;;  %s663_s6 = scalar_lea.vmem %s702_s2, %s444_s24 }
  0x10   : > { %v147_v11 = vld [vmem:[%s624_s3] sm:$0xff]  ;;  %v148_v14 = vld [vmem:[%s624_s3 + $0x8] sm:$0xff]  ;;  %v149_v16 = vld [vmem:[%s624_s3 + $0x10] sm:$0xff] }
  0x11   : > { %v155_v12 = vld [vmem:[%s624_s3 + $0x40] sm:$0xff]  ;;  %505 = vmatprep.mubr.msk.f32.mxu0 %vm171_vm0, %v147_v11  ;;  %540 = vmatpush3.bf16.msra.mxu0 %v537_v8  ;;  %v156_v15 = vld [vmem:[%s624_s3 + $0x48] sm:$0xff]  ;;  %v157_v17 = vld [vmem:[%s624_s3 + $0x50] sm:$0xff] }
  0x12   : > { %517 = vmatprep.mubr.msk.f32.mxu1 %vm171_vm0, %v155_v12  ;;  %551 = vmatpush3.bf16.msra.mxu1 %v537_v8  ;;  %v150_v18 = vld [vmem:[%s624_s3 + $0x18] sm:$0xff]  ;;  %v151_v20 = vld [vmem:[%s624_s3 + $0x20] sm:$0xff]  ;;  %v152_v22 = vld [vmem:[%s624_s3 + $0x28] sm:$0xff] }
  0x13   : > { %542 = vmatprep.subr.bf16.mxu0 %v541_v13  ;;  %548 = vmatprep.subr.bf16.mxu1 %v541_v13  ;;  %v158_v19 = vld [vmem:[%s624_s3 + $0x58] sm:$0xff]  ;;  %v159_v21 = vld [vmem:[%s624_s3 + $0x60] sm:$0xff]  ;;  %v160_v23 = vld [vmem:[%s624_s3 + $0x68] sm:$0xff] }
  0x14   : > { %v153_v24 = vld [vmem:[%s624_s3 + $0x30] sm:$0xff]  ;;  %v154_v26 = vld [vmem:[%s624_s3 + $0x38] sm:$0xff] }
  0x15   : > { %544 = vmatpush3.bf16.msra.mxu0 %v541_v13  ;;  %v161_v25 = vld [vmem:[%s624_s3 + $0x70] sm:$0xff]  ;;  %v162_v27 = vld [vmem:[%s624_s3 + $0x78] sm:$0xff] }
  0x16   : > { %552 = vmatpush3.bf16.msra.mxu1 %v541_v13 }
  0x18   : > { %506 = vmatmul.mubr.msk.f32.vlgmr.msra.gmra.mrb[0].mxu0 %vm171_vm0, %v148_v14 }
  0x19   : > { %518 = vmatmul.mubr.msk.f32.vlgmr.msra.gmra.mrb[0].mxu1 %vm171_vm0, %v156_v15  ;;  %508 = vmatprep.mubr.msk.f32.mxu0 %vm171_vm0, %v149_v16 }
  0x1a   : > { %520 = vmatprep.mubr.msk.f32.mxu1 %vm171_vm0, %v157_v17 }
  0x1c   : > { %509 = vmatmul.mubr.msk.f32.gmra.mrb[2].mxu0 %vm171_vm0, %v150_v18 }
  0x1d   : > { %521 = vmatmul.mubr.msk.f32.gmra.mrb[2].mxu1 %vm171_vm0, %v158_v19  ;;  %511 = vmatprep.mubr.msk.f32.mxu0 %vm171_vm0, %v151_v20 }
  0x1e   : > { %523 = vmatprep.mubr.msk.f32.mxu1 %vm171_vm0, %v159_v21 }
  0x20   : > { %512 = vmatmul.mubr.msk.f32.gmra.mrb[4].mxu0 %vm171_vm0, %v152_v22 }
  0x21   : > { %524 = vmatmul.mubr.msk.f32.gmra.mrb[4].mxu1 %vm171_vm0, %v160_v23  ;;  %514 = vmatprep.mubr.msk.f32.mxu0 %vm171_vm0, %v153_v24 }
  0x22   : > { %526 = vmatprep.mubr.msk.f32.mxu1 %vm171_vm0, %v161_v25 }
  0x24   : > { %515 = vmatmul.mubr.msk.f32.gmra.mrb[6].mxu0 %vm171_vm0, %v154_v26 }
  0x25   : > { %527 = vmatmul.mubr.msk.f32.gmra.mrb[6].mxu1 %vm171_vm0, %v162_v27 }
  0xeb   : > { %v507_v28 = vpop.f32.mrb[0].mxu0 }
  0xec   : > { %v519_v29 = vpop.f32.mrb[0].mxu1  ;;  %367 = vst.msk [vmem:[%s663_s6 + $0x8] sm:$0xff] %vm365_vm1, %v507_v28  ;;  %v286_v30 = vpop.f32.mrb[1].mxu0 }
  0xed   : > { %375 = vst.msk [vmem:[%s663_s6 + $0x48] sm:$0xff] %vm365_vm1, %v519_v29  ;;  %v326_v31 = vpop.f32.mrb[1].mxu1  ;;  %366 = vst.msk [vmem:[%s663_s6] sm:$0xff] %vm365_vm1, %v286_v30 }
  0xee   : > { %374 = vst.msk [vmem:[%s663_s6 + $0x40] sm:$0xff] %vm365_vm1, %v326_v31 }
  0xef   : > { %v510_v32 = vpop.f32.mrb[2].mxu0 }
  0xf0   : > { %v522_v33 = vpop.f32.mrb[2].mxu1  ;;  %369 = vst.msk [vmem:[%s663_s6 + $0x18] sm:$0xff] %vm365_vm1, %v510_v32  ;;  %v296_v34 = vpop.f32.mrb[3].mxu0 }
  0xf1   : > { %377 = vst.msk [vmem:[%s663_s6 + $0x58] sm:$0xff] %vm365_vm1, %v522_v33  ;;  %v336_v35 = vpop.f32.mrb[3].mxu1  ;;  %368 = vst.msk [vmem:[%s663_s6 + $0x10] sm:$0xff] %vm365_vm1, %v296_v34 }
  0xf2   : > { %376 = vst.msk [vmem:[%s663_s6 + $0x50] sm:$0xff] %vm365_vm1, %v336_v35 }
  0xf3   : > { %v513_v36 = vpop.f32.mrb[4].mxu0 }
  0xf4   : > { %v525_v37 = vpop.f32.mrb[4].mxu1  ;;  %371 = vst.msk [vmem:[%s663_s6 + $0x28] sm:$0xff] %vm365_vm1, %v513_v36  ;;  %v306_v38 = vpop.f32.mrb[5].mxu0 }
  0xf5   : > { %379 = vst.msk [vmem:[%s663_s6 + $0x68] sm:$0xff] %vm365_vm1, %v525_v37  ;;  %v346_v39 = vpop.f32.mrb[5].mxu1  ;;  %370 = vst.msk [vmem:[%s663_s6 + $0x20] sm:$0xff] %vm365_vm1, %v306_v38 }
  0xf6   : > { %378 = vst.msk [vmem:[%s663_s6 + $0x60] sm:$0xff] %vm365_vm1, %v346_v39 }
  0xf7   : > { %v516_v40 = vpop.f32.mrb[6].mxu0 }
  0xf8   : > { %v528_v41 = vpop.f32.mrb[6].mxu1  ;;  %373 = vst.msk [vmem:[%s663_s6 + $0x38] sm:$0xff] %vm365_vm1, %v516_v40  ;;  %v316_v42 = vpop.f32.mrb[7].mxu0 }
  0xf9   : > { %381 = vst.msk [vmem:[%s663_s6 + $0x78] sm:$0xff] %vm365_vm1, %v528_v41  ;;  %v356_v43 = vpop.f32.mrb[7].mxu1  ;;  %372 = vst.msk [vmem:[%s663_s6 + $0x30] sm:$0xff] %vm365_vm1, %v316_v42 }
  0xfa   : > { %380 = vst.msk [vmem:[%s663_s6 + $0x70] sm:$0xff] %vm365_vm1, %v356_v43 }
  0xfb PF: > { %s12_s9 = sadd.s32 1, %s567_s9  }
  0xfc   : > { %p9_p4 = scmp.ge.s32.totalorder %s12_s9, 4  }
  0xfe   :  { %11 = sbr.rel (!%p9_p4) target bundleno = 1 (0x1), region = 58 }

</bundles_post_ra>
